<compile_context>
chip_gen: v6e
topology: v6e:2x2x1
jax: 0.10.0
libtpu: 0.0.40
codegen_flags: <defaults>
</compile_context>

<pallas_src>
import functools
import math

import jax
import jax.numpy as jnp
from jax.experimental import pallas as pl
from jax.experimental.pallas import tpu as pltpu


# ---------------------------------------------------------------------------
# Kernel 1: fused QKV projection   y = x @ [wq*scale | wk | wv] + [bq*scale | bk | bv]
# ---------------------------------------------------------------------------
def _qkv_proj_kernel(x_ref, w_ref, b_ref, qkv_ref):
    x = x_ref[0]                                              # (tp, H) bf16
    y = jnp.dot(x, w_ref[...], preferred_element_type=jnp.float32)
    qkv_ref[0] = (y + b_ref[...]).astype(qkv_ref.dtype)       # (tp, tn) bf16


# ---------------------------------------------------------------------------
# Kernel 2: flash attention over head-major Q / K^T / V + fused output projection
# ---------------------------------------------------------------------------
def _attn_kernel(q_ref, kt_ref, v_ref, wo_ref, bo_ref, o_ref,
                 acc_scr, m_scr, l_scr, ctx_scr,
                 *, num_heads, head_size, seq_len, seq_len_padded):
    ki = pl.program_id(2)
    nk = pl.num_programs(2)
    tq = acc_scr.shape[1]
    tk = kt_ref.shape[3]

    # ---- per (batch, query-tile) init: reset online-softmax state -------------
    @pl.when(ki == 0)
    def _init():
        m_scr[...] = jnp.full(m_scr.shape, -jnp.inf, m_scr.dtype)
        l_scr[...] = jnp.zeros(l_scr.shape, l_scr.dtype)
        acc_scr[...] = jnp.zeros(acc_scr.shape, acc_scr.dtype)

    # ---- key-padding mask (computed once per grid step, shared by all heads) --
    if seq_len_padded != seq_len:
        key_ids = ki * tk + jax.lax.broadcasted_iota(jnp.int32, (tq, tk), 1)
        kmask = key_ids < seq_len
    else:
        kmask = None

    # ---- per-head online-softmax update (leading-axis head indexing only) -----
    # TODO(synk): lax.fori_loop over heads for many-head configs.
    for h in range(num_heads):
        q_h = q_ref[0, h]                                     # (tq, hd) bf16
        k_h = kt_ref[0, h]                                    # (hd, tk) bf16 (pre-transposed)
        v_h = v_ref[0, h]                                     # (tk, hd) bf16

        # scores = (q*scale) @ k : plain matmul, no in-kernel transpose
        s = jnp.dot(q_h, k_h, preferred_element_type=jnp.float32)   # (tq, tk) f32
        if kmask is not None:
            s = jnp.where(kmask, s, -jnp.inf)

        m_prev = m_scr[:, h:h + 1]                            # (tq, 1)
        l_prev = l_scr[:, h:h + 1]                            # (tq, 1)
        m_new = jnp.maximum(m_prev, jnp.max(s, axis=-1, keepdims=True))
        alpha = jnp.exp(m_prev - m_new)                       # (tq, 1)
        p = jnp.exp(s - m_new)                                # (tq, tk)

        l_scr[:, h:h + 1] = alpha * l_prev + jnp.sum(p, axis=-1, keepdims=True)
        acc_scr[h] = alpha * acc_scr[h] + jnp.dot(
            p.astype(v_h.dtype), v_h, preferred_element_type=jnp.float32)
        m_scr[:, h:h + 1] = m_new

    # ---- last KV tile: normalize, merge heads (once), apply output projection -
    @pl.when(ki == nk - 1)
    def _finalize():
        for h in range(num_heads):
            lo = h * head_size
            inv_l = pl.reciprocal(l_scr[:, h:h + 1], approx=True)
            ctx_scr[:, lo:lo + head_size] = (acc_scr[h] * inv_l).astype(ctx_scr.dtype)
        out = jnp.dot(ctx_scr[...], wo_ref[...],
                      preferred_element_type=jnp.float32) + bo_ref[...]
        o_ref[0] = out.astype(o_ref.dtype)


# ---------------------------------------------------------------------------
# Helpers
# ---------------------------------------------------------------------------
def _round_up(x, m):
    return (x + m - 1) // m * m


def _tile_candidates(s_pad):
    cands = [t for t in (512, 256, 128) if s_pad % t == 0]
    return cands or [s_pad]


def _col_tile(n):
    for t in (1024, 512, 256, 128):
        if n % t == 0:
            return t
    return n


def _vmem_capacity_bytes():
    try:
        return int(pltpu.get_tpu_info().vmem_capacity_bytes)
    except Exception:
        return 64 * 1024 * 1024   # conservative (v7x physical VMEM)


def _attn_vmem_estimate(tq, tk, hidden, num_heads, head_size):
    bf16, f32, lane = 2, 4, 128
    hd_lane = _round_up(head_size, lane)
    return (2 * num_heads * tq * head_size * bf16        # Q tiles (double-buffered)
            + 2 * num_heads * head_size * tk * bf16      # K^T tiles
            + 2 * num_heads * tk * head_size * bf16      # V tiles
            + 2 * hidden * hidden * bf16                 # wo (double-buffered)
            + 2 * hidden * f32                           # bo
            + 2 * tq * hidden * f32                      # output tiles
            + num_heads * tq * hd_lane * f32             # acc scratch (lane-padded)
            + 2 * tq * lane * f32                        # m / l scratch
            + tq * hidden * bf16                         # ctx scratch
            + 2 * tq * tk * f32)                         # in-flight score temporaries


# ---------------------------------------------------------------------------
# Wrapper
# ---------------------------------------------------------------------------
def multi_head_attention(x, params, num_heads):
    """x: [B, S, H] float32; params: dict with wq,bq,wk,bk,wv,bv,wo,bo."""
    B, S, H = x.shape
    assert H % num_heads == 0, "hidden_size must be divisible by num_attn_heads"
    head_size = H // num_heads
    scale = 1.0 / math.sqrt(head_size)

    # ---- padding / tile selection (VMEM-budget aware, generation aware) -------
    S_pad = _round_up(S, 128)
    vmem_cap = _vmem_capacity_bytes()
    vmem_budget = max(vmem_cap - 8 * 1024 * 1024, 16 * 1024 * 1024)

    cands = _tile_candidates(S_pad)
    tq, tk = cands[-1], cands[-1]
    found = False
    for cand_tq in cands:                    # largest first; shrink tk before tq
        for cand_tk in cands:
            if _attn_vmem_estimate(cand_tq, cand_tk, H, num_heads,
                                   head_size) <= vmem_budget:
                tq, tk = cand_tq, cand_tk
                found = True
                break
        if found:
            break

    # ---- operand prep: pad S, fold softmax scale into the Q weights, bf16 -----
    x_pad = x if S_pad == S else jnp.pad(x, ((0, 0), (0, S_pad - S), (0, 0)))
    x_bf = x_pad.astype(jnp.bfloat16)

    w_qkv = jnp.concatenate(
        [params["wq"] * scale, params["wk"], params["wv"]],
        axis=1).astype(jnp.bfloat16)                          # (H, 3H)
    b_qkv = jnp.concatenate(
        [params["bq"] * scale, params["bk"], params["bv"]],
        axis=1).astype(jnp.float32)                           # (1, 3H)
    wo = params["wo"].astype(jnp.bfloat16)
    bo = params["bo"].astype(jnp.float32)

    # ---- Kernel 1: fused QKV projection (computed once per token) -------------
    tn = _col_tile(3 * H)
    n_rows = S_pad // tq
    n_cols = (3 * H) // tn
    proj_cost = pl.CostEstimate(
        flops=int(2 * B * S_pad * H * 3 * H),
        transcendentals=0,
        bytes_accessed=int(B * S_pad * H * 2 * n_cols
                           + H * 3 * H * 2 + 3 * H * 4
                           + B * S_pad * 3 * H * 2))
    qkv = pl.pallas_call(
        _qkv_proj_kernel,
        out_shape=jax.ShapeDtypeStruct((B, S_pad, 3 * H), jnp.bfloat16),
        grid_spec=pltpu.PrefetchScalarGridSpec(
            num_scalar_prefetch=0,
            grid=(B, n_rows, n_cols),
            in_specs=[
                pl.BlockSpec((1, tq, H), lambda b, i, j: (b, i, 0)),   # x
                pl.BlockSpec((H, tn), lambda b, i, j: (0, j)),         # w_qkv
                pl.BlockSpec((1, tn), lambda b, i, j: (0, j)),         # b_qkv
            ],
            out_specs=pl.BlockSpec((1, tq, tn), lambda b, i, j: (b, i, j)),
        ),
        compiler_params=pltpu.CompilerParams(
            dimension_semantics=("parallel", "parallel", "parallel")),
        cost_estimate=proj_cost,
    )(x_bf, w_qkv, b_qkv)

    # ---- wrapper-side layout plumbing to head-major tensors (HBM roofline) ----
    q, k, v = jnp.split(qkv, 3, axis=-1)                       # each (B, S_pad, H) bf16
    q_hm = q.reshape(B, S_pad, num_heads, head_size).transpose(0, 2, 1, 3)   # [B,nh,S,hd]
    kt_hm = k.reshape(B, S_pad, num_heads, head_size).transpose(0, 2, 3, 1)  # [B,nh,hd,S]
    v_hm = v.reshape(B, S_pad, num_heads, head_size).transpose(0, 2, 1, 3)   # [B,nh,S,hd]

    # ---- Kernel 2: flash attention + output projection -------------------------
    n_q = S_pad // tq
    n_k = S_pad // tk

    est = _attn_vmem_estimate(tq, tk, H, num_heads, head_size)
    vmem_limit = None
    if est + est // 4 > 32 * 1024 * 1024:
        # Never request more than physical VMEM minus headroom (v7x-safe clamp).
        vmem_limit = int(min(est + est // 4, vmem_budget))
        vmem_limit = max(vmem_limit, 32 * 1024 * 1024)

    attn_cost = pl.CostEstimate(
        flops=int(B * (4 * num_heads * S_pad * S_pad * head_size
                       + 2 * S_pad * H * H)),
        transcendentals=int(B * num_heads * S_pad * S_pad),
        bytes_accessed=int(B * S_pad * H * 2                   # Q read once
                           + 2 * n_q * B * S_pad * H * 2       # K,V re-read per q-tile
                           + H * H * 2 + H * 4                  # wo, bo
                           + B * S_pad * H * 4))                # output

    kernel = functools.partial(
        _attn_kernel, num_heads=num_heads, head_size=head_size,
        seq_len=S, seq_len_padded=S_pad)

    out_pad = pl.pallas_call(
        kernel,
        out_shape=jax.ShapeDtypeStruct((B, S_pad, H), jnp.float32),
        grid_spec=pltpu.PrefetchScalarGridSpec(
            num_scalar_prefetch=0,
            grid=(B, n_q, n_k),
            in_specs=[
                pl.BlockSpec((1, num_heads, tq, head_size),
                             lambda b, qi, ki: (b, 0, qi, 0)),          # Q (head-major)
                pl.BlockSpec((1, num_heads, head_size, tk),
                             lambda b, qi, ki: (b, 0, 0, ki)),          # K^T (head-major)
                pl.BlockSpec((1, num_heads, tk, head_size),
                             lambda b, qi, ki: (b, 0, ki, 0)),          # V (head-major)
                pl.BlockSpec((H, H), lambda b, qi, ki: (0, 0)),         # wo
                pl.BlockSpec((1, H), lambda b, qi, ki: (0, 0)),         # bo
            ],
            out_specs=pl.BlockSpec((1, tq, H), lambda b, qi, ki: (b, qi, 0)),
            scratch_shapes=[
                pltpu.VMEM((num_heads, tq, head_size), jnp.float32),    # acc (head-major)
                pltpu.VMEM((tq, num_heads), jnp.float32),               # running max m
                pltpu.VMEM((tq, num_heads), jnp.float32),               # running sum l
                pltpu.VMEM((tq, H), jnp.bfloat16),                      # merged context
            ],
        ),
        compiler_params=pltpu.CompilerParams(
            dimension_semantics=("parallel", "parallel", "arbitrary"),
            vmem_limit_bytes=vmem_limit),
        cost_estimate=attn_cost,
    )(q_hm, kt_hm, v_hm, wo, bo)

    return out_pad if S_pad == S else out_pad[:, :S, :]


# ---------------------------------------------------------------------------
# Pure-JAX f32 reference mirroring the PyTorch forward exactly.
# ---------------------------------------------------------------------------
def _reference_mha(x, params, num_heads):
    B, S, H = x.shape
    hd = H // num_heads
    q = x @ params["wq"] + params["bq"][0]
    k = x @ params["wk"] + params["bk"][0]
    v = x @ params["wv"] + params["bv"][0]
    q = q.reshape(B, S, num_heads, hd).transpose(0, 2, 1, 3)
    k = k.reshape(B, S, num_heads, hd).transpose(0, 2, 3, 1)
    v = v.reshape(B, S, num_heads, hd).transpose(0, 2, 1, 3)
    scores = jnp.matmul(q, k) / math.sqrt(hd)
    probs = jax.nn.softmax(scores, axis=-1)
    ctx = jnp.matmul(probs, v)
    ctx = ctx.transpose(0, 2, 1, 3).reshape(B, S, H)
    return ctx @ params["wo"] + params["bo"][0]


if __name__ == "__main__":
    # Small shapes consistent with the module: batch=2, seq=8, hidden=32, heads=4
    B, S, H, NH = 2, 8, 32, 4

    key = jax.random.PRNGKey(0)
    keys = jax.random.split(key, 9)
    x = jax.random.normal(keys[0], (B, S, H), dtype=jnp.float32)

    def init_linear(kw, kb):
        bound = 1.0 / math.sqrt(H)
        w = jax.random.uniform(kw, (H, H), jnp.float32, -bound, bound)
        b = jax.random.uniform(kb, (1, H), jnp.float32, -bound, bound)
        return w, b

    wq, bq = init_linear(keys[1], keys[2])
    wk, bk = init_linear(keys[3], keys[4])
    wv, bv = init_linear(keys[5], keys[6])
    wo, bo = init_linear(keys[7], keys[8])
    params = dict(wq=wq, bq=bq, wk=wk, bk=bk, wv=wv, bv=bv, wo=wo, bo=bo)

    out = multi_head_attention(x, params, NH)
    out = jax.block_until_ready(out)

    ref = _reference_mha(x, params, NH)
    assert out.shape == (B, S, H)
    # bf16 MXU operands -> compare with bf16-appropriate tolerance.
    max_err = float(jnp.max(jnp.abs(out - ref)))
    assert jnp.allclose(out, ref, atol=2e-2, rtol=2e-2), (
        f"mismatch vs reference, max abs err = {max_err:.3e}")

    print("KERNEL_OK")
</pallas_src>

<mosaic_0001>
module attributes {stable_mosaic.version = 11 : i64} {
  func.func @_qkv_proj_kernel(%arg0: i32, %arg1: i32, %arg2: i32, %arg3: memref<1x128x32xbf16, #tpu.memory_space<vmem>>, %arg4: memref<32x96xbf16, #tpu.memory_space<vmem>>, %arg5: memref<1x96xf32, #tpu.memory_space<vmem>>, %arg6: memref<1x128x96xbf16, #tpu.memory_space<vmem>>) attributes {dimension_semantics = [#tpu.dimension_semantics<parallel>, #tpu.dimension_semantics<parallel>, #tpu.dimension_semantics<parallel>], iteration_bounds = array<i64: 2, 1, 1>, scalar_prefetch = 0 : i64, scratch_operands = 0 : i64, tpu.core_type = #tpu.core_type<tc>, window_params = [{transform_indices = @transform_0, window_bounds = array<i64: 1, 128, 32>}, {transform_indices = @transform_1, window_bounds = array<i64: 32, 96>}, {transform_indices = @transform_2, window_bounds = array<i64: 1, 96>}, {transform_indices = @transform_3, window_bounds = array<i64: 1, 128, 96>}]} {
    %c0 = arith.constant 0 : index
    %c0_0 = arith.constant 0 : index
    %c0_1 = arith.constant 0 : index
    %0 = vector.load %arg3[%c0, %c0_0, %c0_1] : memref<1x128x32xbf16, #tpu.memory_space<vmem>>, vector<1x128x32xbf16>
    %1 = vector.shape_cast %0 : vector<1x128x32xbf16> to vector<128x32xbf16>
    %c0_2 = arith.constant 0 : index
    %c0_3 = arith.constant 0 : index
    %2 = vector.load %arg4[%c0_2, %c0_3] : memref<32x96xbf16, #tpu.memory_space<vmem>>, vector<32x96xbf16>
    %cst = arith.constant dense<0.000000e+00> : vector<128x96xf32>
    %3 = tpu.matmul %1, %2, %cst {dimension_numbers = #tpu.dot_dimension_numbers<[1], [0], [0], [1], [0, 0, 1, 1], [], []>} : vector<128x32xbf16>, vector<32x96xbf16>, vector<128x96xf32> -> vector<128x96xf32>
    %c0_4 = arith.constant 0 : index
    %c0_5 = arith.constant 0 : index
    %4 = vector.load %arg5[%c0_4, %c0_5] : memref<1x96xf32, #tpu.memory_space<vmem>>, vector<1x96xf32>
    %5 = vector.broadcast %4 : vector<1x96xf32> to vector<128x96xf32>
    %6 = arith.addf %3, %5 : vector<128x96xf32>
    %7 = arith.truncf %6 : vector<128x96xf32> to vector<128x96xbf16>
    %c0_6 = arith.constant 0 : index
    %c0_7 = arith.constant 0 : index
    %c0_8 = arith.constant 0 : index
    %8 = vector.load %arg6[%c0_6, %c0_7, %c0_8] : memref<1x128x96xbf16, #tpu.memory_space<vmem>>, vector<1x128x96xbf16>
    %9 = vector.shape_cast %8 : vector<1x128x96xbf16> to vector<128x96xbf16>
    %10 = vector.shape_cast %7 : vector<128x96xbf16> to vector<1x128x96xbf16>
    tpu.vector_store %arg6[%c0_6, %c0_7, %c0_8], %10 {strides = array<i32>} : memref<1x128x96xbf16, #tpu.memory_space<vmem>>, vector<1x128x96xbf16>,
    return
  }
  func.func @transform_0(%arg0: i32, %arg1: i32, %arg2: i32) -> (i32, i32, i32) {
    %c0_i32 = arith.constant 0 : i32
    %c0_i32_0 = arith.constant 0 : i32
    return %arg0, %arg1, %c0_i32 : i32, i32, i32
  }
  func.func @transform_1(%arg0: i32, %arg1: i32, %arg2: i32) -> (i32, i32) {
    %c0_i32 = arith.constant 0 : i32
    %c0_i32_0 = arith.constant 0 : i32
    return %c0_i32, %arg2 : i32, i32
  }
  func.func @transform_2(%arg0: i32, %arg1: i32, %arg2: i32) -> (i32, i32) {
    %c0_i32 = arith.constant 0 : i32
    %c0_i32_0 = arith.constant 0 : i32
    return %c0_i32, %arg2 : i32, i32
  }
  func.func @transform_3(%arg0: i32, %arg1: i32, %arg2: i32) -> (i32, i32, i32) {
    %c0_i32 = arith.constant 0 : i32
    return %arg0, %arg1, %arg2 : i32, i32, i32
  }
}

</mosaic_0001>

<bundles_post_ra>
// kernel: tpu_custom_call.1
= control target key start
LH: loop header
LB: loop body
LE: loop exit
PB: predicated region body
PF: predicated region fallthrough
CT: control target
= control target key end

     0   :  { %s844_s12 = smov 0   ;;  %s846_s13 = smov 0   ;;  %s931_s0 = inlined_call_operand.vmem [shape: bf16[2,128,32], index: 0, kind: input, shape index: {}]   ;;  %s932_s1 = inlined_call_operand.vmem [shape: bf16[32,96], index: 1, kind: input, shape index: {}]   ;;  %s933_s2 = inlined_call_operand.vmem [shape: f32[1,96], index: 2, kind: input, shape index: {}]   ;;  %s934_s3 = inlined_call_operand.vmem [shape: bf16[2,128,96], index: 3, kind: output, shape index: {}]  }
   0x1   :  { %s848_s14 = smov 0  }
   0x2 LB: > { %s32_s15 = sadd.s32 1, %s818_s13  ;;  %p672_p0 = scmp.ge.s32.totalorder %s822_s14, 1  ;;  %s822_s14 = sphi %s848_s14, %s13_s14   ;;  %s818_s13 = sphi %s846_s13, %s936_s13   ;;  %s814_s12 = sphi %s844_s12, %s935_s12  }
   0x3   : > { %p34_p1 = scmp.ge.s32.totalorder %s32_s15, 2  ;;  %p184_p2 = scmp.lt.s32.totalorder %s822_s14, 3 }
   0x5   : > { %s938_s15 = smov (%p34_p1, %s32_s15), 0  ;;  %p185_p3 = pnand %p672_p0, %p184_p2 }
   0x6   : > { %p227_p4 = scmp.lt.s32.totalorder (!%p185_p3), %s814_s12, 1 }
   0x7   : > { %188 = sbr.rel (%p185_p3) target bundleno = 233 (0xe9), region = 32 }
   0xc   : > { %v790_v0 = vld [vmem:[%s932_s1 + $0x8] sm:$0xff]   ;;  %v791_v1 = vld [vmem:[%s932_s1] sm:$0xff]   ;;  %s940_s12 = smov (!%p227_p4, %s814_s12), 1  ;;  %vm336_vm0 = vcmask 261120   ;;  %vm522_vm1 = vcmask 781312  }
   0xd   : > { %742 = vmatprep.subr.bf16.mxu0 %v790_v0  ;;  %762 = vmatprep.subr.bf16.mxu1 %v790_v0  ;;  %s714_s20 = sshll.u32 %s940_s12, 6  ;;  %v677_v10 = vld [vmem:[%s933_s2] ss:$0 sm:$0xff] }
   0xe   : > { %743 = vmatpush3.bf16.msra.mxu0 %v790_v0  ;;  %764 = vmatpush3.bf16.msra.mxu1 %v790_v0  ;;  %s234_s23 = scalar_lea.vmem %s931_s0, %s714_s20  ;;  %s888_s28 = scalar_lea.vmem %s934_s3, %s714_s20 }
   0xf   : > { %744 = vmatprep.subr.bf16.mxu0 %v791_v1  ;;  %763 = vmatprep.subr.bf16.mxu1 %v791_v1  ;;  %v792_v2 = vld [vmem:[%s234_s23] sm:$0xff]   ;;  %v794_v4 = vld [vmem:[%s234_s23 + $0x8] sm:$0xff]   ;;  %v796_v6 = vld [vmem:[%s234_s23 + $0x10] sm:$0xff]  }
  0x10   : > { %v793_v3 = vld [vmem:[%s234_s23 + $0x20] sm:$0xff]   ;;  %746 = vmatprep.mubr.msk.bf16.mxu0 %vm336_vm0, %v792_v2  ;;  %v795_v5 = vld [vmem:[%s234_s23 + $0x28] sm:$0xff]   ;;  %v797_v7 = vld [vmem:[%s234_s23 + $0x30] sm:$0xff]  }
  0x11   : > { %754 = vmatprep.mubr.msk.bf16.mxu1 %vm336_vm0, %v793_v3  ;;  %v798_v8 = vld [vmem:[%s234_s23 + $0x18] sm:$0xff]  }
  0x12   : > { %745 = vmatpush3.bf16.msra.mxu0 %v791_v1  ;;  %765 = vmatpush3.bf16.msra.mxu1 %v791_v1  ;;  %v799_v9 = vld [vmem:[%s234_s23 + $0x38] sm:$0xff]  }
  0x15   : > { %747 = vmatmul.mubr.msk.bf16.vlgmr.msra.gmra.mxu0 %vm336_vm0, %v794_v4  ;;  %755 = vmatmul.mubr.msk.bf16.vlgmr.msra.gmra.mxu1 %vm336_vm0, %v795_v5 }
  0x16   : > { %750 = vmatprep.mubr.msk.bf16.mxu0 %vm336_vm0, %v796_v6  ;;  %758 = vmatprep.mubr.msk.bf16.mxu1 %vm336_vm0, %v797_v7 }
  0x1d   : > { %751 = vmatmul.mubr.msk.bf16.gmra.mxu0 %vm336_vm0, %v798_v8  ;;  %759 = vmatmul.mubr.msk.bf16.gmra.mxu1 %vm336_vm0, %v799_v9 }
  0xd5   : > { %v748_v11 = vpop.f32.mrf.mxu0  ;;  %v756_v13 = vpop.f32.mrf.mxu1 }
  0xd6   : > { %v404_v12 = vadd.f32 %v748_v11, %v677_v10  ;;  %v436_v14 = vadd.f32 %v756_v13, %v677_v10 }
  0xd7   : > { %v395_v15 = vpop.f32.mrf.mxu0  ;;  %v427_v18 = vpop.f32.mrf.mxu1 }
  0xd8   : > { %v718_v16 = vpack.c.bf16 %v404_v12, %v404_v12  ;;  %v396_v17 = vadd.f32 %v677_v10, %v395_v15  ;;  %v726_v19 = vpack.c.bf16 %v436_v14, %v436_v14  ;;  %v428_v20 = vadd.f32 %v677_v10, %v427_v18 }
  0xd9   : > { %v749_v21 = vpop.f32.mrf.mxu0  ;;  %v757_v24 = vpop.f32.mrf.mxu1 }
  0xda   : > { %525 = vst.msk [vmem:[%s888_s28 + $0x8] sm:$0xf] %vm522_vm1, %v718_v16  ;;  %v716_v22 = vpack.c.bf16 %v396_v17, %v396_v17  ;;  %v407_v23 = vadd.f32 %v749_v21, %v677_v10  ;;  %533 = vst.msk [vmem:[%s888_s28 + $0x28] sm:$0xf] %vm522_vm1, %v726_v19  ;;  %v724_v25 = vpack.c.bf16 %v428_v20, %v428_v20 }
  0xdb   : > { %v439_v26 = vadd.f32 %v757_v24, %v677_v10  ;;  %v398_v27 = vpop.f32.mrf.mxu0  ;;  %v430_v30 = vpop.f32.mrf.mxu1 }
  0xdc   : > { %523 = vst.msk [vmem:[%s888_s28] sm:$0xf] %vm522_vm1, %v716_v22  ;;  %v719_v28 = vpack.c.bf16 %v407_v23, %v407_v23  ;;  %v399_v29 = vadd.f32 %v677_v10, %v398_v27  ;;  %531 = vst.msk [vmem:[%s888_s28 + $0x20] sm:$0xf] %vm522_vm1, %v724_v25  ;;  %v431_v32 = vadd.f32 %v677_v10, %v430_v30 }
  0xdd   : > { %v727_v31 = vpack.c.bf16 %v439_v26, %v439_v26  ;;  %v752_v33 = vpop.f32.mrf.mxu0  ;;  %v760_v36 = vpop.f32.mrf.mxu1 }
  0xde   : > { %526 = vst.msk [vmem:[%s888_s28 + $0xc] sm:$0xf] %vm522_vm1, %v719_v28  ;;  %v717_v34 = vpack.c.bf16 %v399_v29, %v399_v29  ;;  %v420_v35 = vadd.f32 %v752_v33, %v677_v10  ;;  %v725_v37 = vpack.c.bf16 %v431_v32, %v431_v32  ;;  %v452_v38 = vadd.f32 %v760_v36, %v677_v10 }
  0xdf   : > { %534 = vst.msk [vmem:[%s888_s28 + $0x2c] sm:$0xf] %vm522_vm1, %v727_v31  ;;  %v411_v39 = vpop.f32.mrf.mxu0  ;;  %v443_v42 = vpop.f32.mrf.mxu1 }
  0xe0   : > { %524 = vst.msk [vmem:[%s888_s28 + $0x4] sm:$0xf] %vm522_vm1, %v717_v34  ;;  %v722_v40 = vpack.c.bf16 %v420_v35, %v420_v35  ;;  %v412_v41 = vadd.f32 %v677_v10, %v411_v39  ;;  %532 = vst.msk [vmem:[%s888_s28 + $0x24] sm:$0xf] %vm522_vm1, %v725_v37  ;;  %v730_v43 = vpack.c.bf16 %v452_v38, %v452_v38 }
  0xe1   : > { %v444_v44 = vadd.f32 %v677_v10, %v443_v42  ;;  %v753_v45 = vpop.f32.mrf.mxu0  ;;  %v761_v48 = vpop.f32.mrf.mxu1 }
  0xe2   : > { %529 = vst.msk [vmem:[%s888_s28 + $0x18] sm:$0xf] %vm522_vm1, %v722_v40  ;;  %v720_v46 = vpack.c.bf16 %v412_v41, %v412_v41  ;;  %v423_v47 = vadd.f32 %v753_v45, %v677_v10  ;;  %537 = vst.msk [vmem:[%s888_s28 + $0x38] sm:$0xf] %vm522_vm1, %v730_v43  ;;  %v455_v50 = vadd.f32 %v761_v48, %v677_v10 }
  0xe3   : > { %v728_v49 = vpack.c.bf16 %v444_v44, %v444_v44  ;;  %v414_v51 = vpop.f32.mrf.mxu0  ;;  %v446_v54 = vpop.f32.mrf.mxu1 }
  0xe4   : > { %527 = vst.msk [vmem:[%s888_s28 + $0x10] sm:$0xf] %vm522_vm1, %v720_v46  ;;  %v723_v52 = vpack.c.bf16 %v423_v47, %v423_v47  ;;  %v415_v53 = vadd.f32 %v677_v10, %v414_v51  ;;  %v731_v55 = vpack.c.bf16 %v455_v50, %v455_v50  ;;  %v447_v56 = vadd.f32 %v677_v10, %v446_v54 }
  0xe5   : > { %535 = vst.msk [vmem:[%s888_s28 + $0x30] sm:$0xf] %vm522_vm1, %v728_v49 }
  0xe6   : > { %530 = vst.msk [vmem:[%s888_s28 + $0x1c] sm:$0xf] %vm522_vm1, %v723_v52  ;;  %v721_v57 = vpack.c.bf16 %v415_v53, %v415_v53  ;;  %538 = vst.msk [vmem:[%s888_s28 + $0x3c] sm:$0xf] %vm522_vm1, %v731_v55  ;;  %v729_v58 = vpack.c.bf16 %v447_v56, %v447_v56 }
  0xe8   : > { %528 = vst.msk [vmem:[%s888_s28 + $0x14] sm:$0xf] %vm522_vm1, %v721_v57  ;;  %536 = vst.msk [vmem:[%s888_s28 + $0x34] sm:$0xf] %vm522_vm1, %v729_v58 }
  0xe9 PF: > { %s13_s14 = sadd.s32 1, %s822_s14   ;;  %s935_s12 = smov %s818_s13 }
  0xea   : > { %p10_p5 = scmp.ge.s32.totalorder %s13_s14, 4   ;;  %s936_s13 = smov %s938_s15 }
  0xec   :  { %12 = sbr.rel (!%p10_p5) target bundleno = 2 (0x2), region = 68 }

</bundles_post_ra>
